<compile_context>
chip_gen: v5e
topology: v5e:2x2
jax: 0.10.0
libtpu: 0.0.40
codegen_flags: <defaults>
</compile_context>

<pallas_src>
import functools

import jax
import jax.numpy as jnp
from jax import lax
from jax.experimental import pallas as pl
from jax.experimental.pallas import tpu as pltpu


def _round_up(a: int, b: int) -> int:
    return (a + b - 1) // b * b


def _pick_tile(padded_dim: int, candidates) -> int:
    """Largest candidate tile that evenly divides the padded dimension."""
    for c in candidates:
        if padded_dim % c == 0:
            return c
    return candidates[-1]


def _value_kernel(x_ref, w_ref, o_ref, acc_ref):
    # x_ref: (tm, tk) activation block
    # w_ref: (tn, tk) weight block (native PyTorch (N, K) layout — no transpose)
    # o_ref: (tm, tn) output block (resident across the K axis)
    # acc_ref: (tm, tn) f32 accumulator in VMEM scratch
    k = pl.program_id(2)

    @pl.when(k == 0)
    def _():
        acc_ref[...] = jnp.zeros_like(acc_ref)

    # Contract x's K axis against w's K axis on the MXU, f32 accumulate.
    acc_ref[...] += lax.dot_general(
        x_ref[...],
        w_ref[...],
        dimension_numbers=(((1,), (1,)), ((), ())),
        preferred_element_type=jnp.float32,
    )

    @pl.when(k == pl.num_programs(2) - 1)
    def _():
        o_ref[...] = acc_ref[...].astype(o_ref.dtype)


def value_forward(x, w):
    """Forward pass of Value: y = x @ W.T.

    x: (..., dim_embed), w: (dim_hidden, dim_embed) (PyTorch nn.Linear layout).
    Returns: (..., dim_hidden), same dtype as x.

    Note: for genuinely tiny problems (a few KFLOP) plain `x @ w.T` via XLA is
    faster than any custom kernel; callers on that path may bypass this.
    """
    dim_hidden, dim_embed = w.shape
    lead_shape = x.shape[:-1]
    x2d = x.reshape(-1, dim_embed)  # (M, K)
    M, K = x2d.shape
    N = dim_hidden

    # ---- Tile selection (lane / MXU aligned) -------------------------------
    # Output last dim (tn) and contraction dim (tk) must be multiples of 128
    # so stores are unmasked and MXU tiles are full; tm needs multiples of 8.
    Mp = _round_up(M, 8)
    Kp = _round_up(K, 128)
    Np = _round_up(N, 128)
    tm = _pick_tile(Mp, (256, 128, 64, 32, 16, 8))
    tk = _pick_tile(Kp, (512, 256, 128))
    tn = _pick_tile(Np, (256, 128))

    # ---- Zero-pad to tile multiples (zeros contribute nothing to the matmul)
    xp = x2d
    if (Mp, Kp) != (M, K):
        xp = jnp.pad(x2d, ((0, Mp - M), (0, Kp - K)))
    wp = w
    if (Np, Kp) != (N, K):
        wp = jnp.pad(w, ((0, Np - N), (0, Kp - K)))

    grid = (Mp // tm, Np // tn, Kp // tk)

    itemsize = jnp.dtype(x.dtype).itemsize
    cost = pl.CostEstimate(
        flops=2 * Mp * Np * Kp,
        transcendentals=0,
        bytes_accessed=(Mp * Kp + Np * Kp + Mp * Np) * itemsize,
    )

    out_padded = pl.pallas_call(
        _value_kernel,
        out_shape=jax.ShapeDtypeStruct((Mp, Np), x.dtype),
        grid_spec=pltpu.PrefetchScalarGridSpec(
            num_scalar_prefetch=0,
            grid=grid,
            in_specs=[
                pl.BlockSpec((tm, tk), lambda i, j, k: (i, k)),  # activations
                pl.BlockSpec((tn, tk), lambda i, j, k: (j, k)),  # weight (N, K)
            ],
            out_specs=pl.BlockSpec((tm, tn), lambda i, j, k: (i, j)),
            scratch_shapes=[pltpu.VMEM((tm, tn), jnp.float32)],
        ),
        compiler_params=pltpu.CompilerParams(
            dimension_semantics=("parallel", "parallel", "arbitrary"),
            # Stay well inside v7x's 64 MiB physical VMEM; tiles above use ~3 MiB
            # with double-buffering.
            vmem_limit_bytes=48 * 1024 * 1024,
        ),
        cost_estimate=cost,
    )(xp, wp)

    out2d = out_padded[:M, :N]
    return out2d.reshape(*lead_shape, N)


if __name__ == "__main__":
    # Small shapes consistent with the module: batch=2, seq=8, dim_embed=32, dim_hidden=32
    batch, seq, dim_embed, dim_hidden = 2, 8, 32, 32

    key = jax.random.PRNGKey(0)
    kx, kw = jax.random.split(key)
    x = jax.random.normal(kx, (batch, seq, dim_embed), dtype=jnp.float32)
    # Deterministic init mimicking nn.Linear default (uniform in ±1/sqrt(fan_in))
    bound = 1.0 / (dim_embed ** 0.5)
    w = jax.random.uniform(
        kw, (dim_hidden, dim_embed), dtype=jnp.float32, minval=-bound, maxval=bound
    )

    out = value_forward(x, w)
    out = jax.block_until_ready(out)

    # Sanity check against plain-JAX reference of x @ W.T
    ref = jnp.einsum("bse,he->bsh", x, w)
    assert out.shape == (batch, seq, dim_hidden)
    assert jnp.allclose(out, ref, atol=1e-5, rtol=1e-5)

    print("KERNEL_OK")
</pallas_src>

<mosaic_0001>
module attributes {stable_mosaic.version = 11 : i64} {
  func.func @_value_kernel(%arg0: i32, %arg1: i32, %arg2: i32, %arg3: memref<16x128xf32, #tpu.memory_space<vmem>>, %arg4: memref<128x128xf32, #tpu.memory_space<vmem>>, %arg5: memref<16x128xf32, #tpu.memory_space<vmem>>, %arg6: memref<16x128xf32, #tpu.memory_space<vmem>>) attributes {dimension_semantics = [#tpu.dimension_semantics<parallel>, #tpu.dimension_semantics<parallel>, #tpu.dimension_semantics<arbitrary>], iteration_bounds = array<i64: 1, 1, 1>, scalar_prefetch = 0 : i64, scratch_operands = 1 : i64, tpu.core_type = #tpu.core_type<tc>, window_params = [{transform_indices = @transform_0, window_bounds = array<i64: 16, 128>}, {transform_indices = @transform_1, window_bounds = array<i64: 128, 128>}, {transform_indices = @transform_2, window_bounds = array<i64: 16, 128>}]} {
    %c0_i32 = arith.constant 0 : i32
    %0 = arith.cmpi eq, %arg2, %c0_i32 : i32
    %1 = arith.extui %0 : i1 to i32
    %c0_i32_0 = arith.constant 0 : i32
    %2 = arith.cmpi ne, %1, %c0_i32_0 : i32
    scf.if %2 {
      %cst_10 = arith.constant 0.000000e+00 : f32
      %12 = vector.broadcast %cst_10 : f32 to vector<16x128xf32>
      %c0_11 = arith.constant 0 : index
      %c0_12 = arith.constant 0 : index
      %13 = vector.load %arg6[%c0_11, %c0_12] : memref<16x128xf32, #tpu.memory_space<vmem>>, vector<16x128xf32>
      tpu.vector_store %arg6[%c0_11, %c0_12], %12 {strides = array<i32>} : memref<16x128xf32, #tpu.memory_space<vmem>>, vector<16x128xf32>,
    } else {
    }
    %c0 = arith.constant 0 : index
    %c0_1 = arith.constant 0 : index
    %3 = vector.load %arg6[%c0, %c0_1] : memref<16x128xf32, #tpu.memory_space<vmem>>, vector<16x128xf32>
    %c0_2 = arith.constant 0 : index
    %c0_3 = arith.constant 0 : index
    %4 = vector.load %arg3[%c0_2, %c0_3] : memref<16x128xf32, #tpu.memory_space<vmem>>, vector<16x128xf32>
    %c0_4 = arith.constant 0 : index
    %c0_5 = arith.constant 0 : index
    %5 = vector.load %arg4[%c0_4, %c0_5] : memref<128x128xf32, #tpu.memory_space<vmem>>, vector<128x128xf32>
    %cst = arith.constant dense<0.000000e+00> : vector<16x128xf32>
    %6 = tpu.matmul %4, %5, %cst {dimension_numbers = #tpu.dot_dimension_numbers<[1], [1], [0], [0], [0, 0, 1, 0], [], []>} : vector<16x128xf32>, vector<128x128xf32>, vector<16x128xf32> -> vector<16x128xf32>
    %7 = arith.addf %3, %6 : vector<16x128xf32>
    %c0_6 = arith.constant 0 : index
    %c0_7 = arith.constant 0 : index
    %8 = vector.load %arg6[%c0_6, %c0_7] : memref<16x128xf32, #tpu.memory_space<vmem>>, vector<16x128xf32>
    tpu.vector_store %arg6[%c0_6, %c0_7], %7 {strides = array<i32>} : memref<16x128xf32, #tpu.memory_space<vmem>>, vector<16x128xf32>,
    %c0_i32_8 = arith.constant 0 : i32
    %9 = arith.cmpi eq, %arg2, %c0_i32_8 : i32
    %10 = arith.extui %9 : i1 to i32
    %c0_i32_9 = arith.constant 0 : i32
    %11 = arith.cmpi ne, %10, %c0_i32_9 : i32
    scf.if %11 {
      %c0_10 = arith.constant 0 : index
      %c0_11 = arith.constant 0 : index
      %12 = vector.load %arg6[%c0_10, %c0_11] : memref<16x128xf32, #tpu.memory_space<vmem>>, vector<16x128xf32>
      %c0_12 = arith.constant 0 : index
      %c0_13 = arith.constant 0 : index
      %13 = vector.load %arg5[%c0_12, %c0_13] : memref<16x128xf32, #tpu.memory_space<vmem>>, vector<16x128xf32>
      tpu.vector_store %arg5[%c0_12, %c0_13], %12 {strides = array<i32>} : memref<16x128xf32, #tpu.memory_space<vmem>>, vector<16x128xf32>,
    } else {
    }
    return
  }
  func.func @transform_0(%arg0: i32, %arg1: i32, %arg2: i32) -> (i32, i32) {
    %c0_i32 = arith.constant 0 : i32
    return %arg0, %arg2 : i32, i32
  }
  func.func @transform_1(%arg0: i32, %arg1: i32, %arg2: i32) -> (i32, i32) {
    %c0_i32 = arith.constant 0 : i32
    return %arg1, %arg2 : i32, i32
  }
  func.func @transform_2(%arg0: i32, %arg1: i32, %arg2: i32) -> (i32, i32) {
    %c0_i32 = arith.constant 0 : i32
    return %arg0, %arg1 : i32, i32
  }
}

</mosaic_0001>

<bundles_post_ra>
// kernel: tpu_custom_call.1
= control target key start
LH: loop header
LB: loop body
LE: loop exit
PB: predicated region body
PF: predicated region fallthrough
CT: control target
= control target key end

     0   :  { %7 = vsyncpa [#allocation4], 0  ;;  %s261_s0 = inlined_call_operand.hbm [shape: f32[16,128], index: 0, kind: input, shape index: {}]   ;;  %s262_s1 = inlined_call_operand.hbm [shape: f32[128,128], index: 1, kind: input, shape index: {}]   ;;  %s263_s2 = inlined_call_operand.hbm [shape: f32[16,128], index: 2, kind: output, shape index: {}]  }
   0x1   :  { %8 = vsyncpa [#allocation7], 0 }
   0x2   :  { %9 = vsyncpa [#allocation5], 0  ;;  %s14_s11 = sshll.u32 %s261_s0, 4  ;;  %s223_s12 = smov [#allocation3]   ;;  %s15_s11 = int_to_ptr.hbm [resolvable:$true] %s14_s11 }
   0x3   :  { %s16_s13 = sshll.u32 %s223_s12, 4  ;;  %s27_s16 = sshll.u32 %s262_s1, 4  ;;  %s17_s13 = int_to_ptr.vmem [resolvable:$true] %s16_s13  ;;  %s28_s16 = int_to_ptr.hbm [resolvable:$true] %s27_s16 }
   0x4   :  { %s224_s17 = smov 128   ;;  %s225_s18 = smov 8  }
   0x5   :  { %22 = dma.hbm_to_vmem [thread:$0]  %s15_s11, 256, %s17_s13, [#allocation4], %s224_s17, %s224_s17, %s225_s18  }
   0x6   :  { %s226_s19 = smov [#allocation6]  }
   0x7   :  { %s29_s20 = sshll.u32 %s226_s19, 4  ;;  %s30_s20 = int_to_ptr.vmem [resolvable:$true] %s29_s20 }
   0x8   :  { %35 = dma.hbm_to_vmem [thread:$0]  %s28_s16, 2048, %s30_s20, [#allocation7], %s224_s17, %s224_s17, %s225_s18  }
   0x9   :  { %217 = dma.done.wait [#allocation4], 256  }
   0xa   :  { %218 = vsyncadd [#allocation4], 4294967040 }
   0xb   :  { %219 = dma.done.wait [#allocation7], 2048  }
   0xc   :  { %220 = vsyncadd [#allocation7], 4294965248  ;;  %v69_v0 = vld [vmem:[#allocation6 + $0x78] sm:$0xff]  ;;  %v68_v1 = vld [vmem:[#allocation6 + $0x70] sm:$0xff]  ;;  %s227_s0 = smov [#allocation8]   ;;  %s110_s23 = sshll.u32 %s263_s2, 4  ;;  %s111_s23 = int_to_ptr.hbm [resolvable:$true] %s110_s23 }
   0xd   :  { %70 = vmatpush.xpose.msra.mxu0 %v69_v0  ;;  %124 = vmatpush.xpose.msra.mxu1 %v69_v0  ;;  %v67_v2 = vld [vmem:[#allocation6 + $0x68] sm:$0xff]  ;;  %v66_v3 = vld [vmem:[#allocation6 + $0x60] sm:$0xff]  ;;  %v65_v4 = vld [vmem:[#allocation6 + $0x58] sm:$0xff]  ;;  %s108_s1 = sshll.u32 %s227_s0, 4  ;;  %s109_s1 = int_to_ptr.vmem [resolvable:$true] %s108_s1 }
   0xe   :  { %v64_v5 = vld [vmem:[#allocation6 + $0x50] sm:$0xff]  ;;  %v63_v6 = vld [vmem:[#allocation6 + $0x48] sm:$0xff]  ;;  %v62_v7 = vld [vmem:[#allocation6 + $0x40] sm:$0xff] }
   0xf   :  { %v61_v8 = vld [vmem:[#allocation6 + $0x38] sm:$0xff]  ;;  %v60_v9 = vld [vmem:[#allocation6 + $0x30] sm:$0xff]  ;;  %v59_v10 = vld [vmem:[#allocation6 + $0x28] sm:$0xff] }
  0x10   :  { %v58_v11 = vld [vmem:[#allocation6 + $0x20] sm:$0xff]  ;;  %v57_v12 = vld [vmem:[#allocation6 + $0x18] sm:$0xff]  ;;  %v56_v13 = vld [vmem:[#allocation6 + $0x10] sm:$0xff] }
  0x11   :  { %71 = vmatpush.xpose.msra.mxu0 %v68_v1  ;;  %125 = vmatpush.xpose.msra.mxu1 %v68_v1  ;;  %v55_v14 = vld [vmem:[#allocation6 + $0x8] sm:$0xff]  ;;  %v54_v15 = vld [vmem:[#allocation6] sm:$0xff]  ;;  %v52_v16 = vld [vmem:[#allocation3] sm:$0xff] }
  0x12   :  { %v53_v17 = vld [vmem:[#allocation3 + $0x8] sm:$0xff] }
  0x15   :  { %72 = vmatpush.xpose.msra.mxu0 %v67_v2  ;;  %126 = vmatpush.xpose.msra.mxu1 %v67_v2 }
  0x19   :  { %73 = vmatpush.xpose.msra.mxu0 %v66_v3  ;;  %127 = vmatpush.xpose.msra.mxu1 %v66_v3 }
  0x1d   :  { %74 = vmatpush.xpose.msra.mxu0 %v65_v4  ;;  %128 = vmatpush.xpose.msra.mxu1 %v65_v4 }
  0x21   :  { %75 = vmatpush.xpose.msra.mxu0 %v64_v5  ;;  %129 = vmatpush.xpose.msra.mxu1 %v64_v5 }
  0x25   :  { %76 = vmatpush.xpose.msra.mxu0 %v63_v6  ;;  %130 = vmatpush.xpose.msra.mxu1 %v63_v6 }
  0x29   :  { %77 = vmatpush.xpose.msra.mxu0 %v62_v7  ;;  %131 = vmatpush.xpose.msra.mxu1 %v62_v7 }
  0x2d   :  { %78 = vmatpush.xpose.msra.mxu0 %v61_v8  ;;  %132 = vmatpush.xpose.msra.mxu1 %v61_v8 }
  0x31   :  { %79 = vmatpush.xpose.msra.mxu0 %v60_v9  ;;  %133 = vmatpush.xpose.msra.mxu1 %v60_v9 }
  0x35   :  { %80 = vmatpush.xpose.msra.mxu0 %v59_v10  ;;  %134 = vmatpush.xpose.msra.mxu1 %v59_v10 }
  0x39   :  { %81 = vmatpush.xpose.msra.mxu0 %v58_v11  ;;  %135 = vmatpush.xpose.msra.mxu1 %v58_v11 }
  0x3d   :  { %82 = vmatpush.xpose.msra.mxu0 %v57_v12  ;;  %136 = vmatpush.xpose.msra.mxu1 %v57_v12 }
  0x41   :  { %83 = vmatpush.xpose.msra.mxu0 %v56_v13  ;;  %137 = vmatpush.xpose.msra.mxu1 %v56_v13 }
  0x45   :  { %84 = vmatpush.xpose.msra.mxu0 %v55_v14  ;;  %138 = vmatpush.xpose.msra.mxu1 %v55_v14 }
  0x49   :  { %85 = vmatpush.xpose.msra.mxu0 %v54_v15  ;;  %139 = vmatpush.xpose.msra.mxu1 %v54_v15 }
  0x4c   :  { %86 = vmatmul.f32.vlgmr.msra.gmra.mxu0 %v52_v16  ;;  %89 = vmatmul.f32.vlgmr.msra.gmra.mxu1 %v53_v17 }
  0xc9   :  { %v87_v18 = vpop.f32.mrf.mxu0  ;;  %v90_v19 = vpop.f32.mrf.mxu1 }
  0xca   :  { %102 = vst [vmem:[#allocation8] sm:$0xff] %v87_v18 }
  0xcb   :  { %103 = vst [vmem:[#allocation8 + $0x8] sm:$0xff] %v90_v19 }
  0xcc   :  { %116 = dma.vmem_to_hbm [thread:$0]  %s109_s1, 256, %s111_s23, [#allocation5], %s224_s17, %s224_s17, %s225_s18  }
  0xcd   :  { %221 = dma.done.wait [#allocation5], 256  }
  0xce   :  { %222 = vsyncadd [#allocation5], 4294967040 }
  0xcf   :  { %121 = vsyncpa [#allocation4], 1 }
  0xd0   :  { %122 = vsyncpa [#allocation7], 1 }
  0xd1   :  { %123 = vsyncpa [#allocation5], 1 }

</bundles_post_ra>
